<compile_context>
chip_gen: v7x
topology: tpu7x:2x2x1
jax: 0.10.0
libtpu: 0.0.40
codegen_flags: <defaults>
</compile_context>

<pallas_src>
import jax
import jax.numpy as jnp
from jax.experimental import pallas as pl
from jax.experimental.pallas import tpu as pltpu

N_HEADS = 8


def st_tokenizer_kernel(static_ref, xflat_ref, wqkv_ref, consts_ref, bias_ref, out_ref):
    f32 = jnp.float32
    bf16 = jnp.bfloat16

    n_roads, d = static_ref.shape          # (N, D)
    td = xflat_ref.shape[1]                # T*D
    h = N_HEADS
    hn = h * n_roads                       # total score columns (= 128 at N=16)

    # ---- packed weights / constants (static, tile-aligned slices of the refs) ----
    w_top = wqkv_ref[0:d, :]               # (D, 3D)    bf16  QKV weight, static half
    w_dyn = wqkv_ref[d:d + td, :]          # (T*D, 3D)  bf16  QKV weight with Conv1d folded in
    mask_kv = consts_ref[:, 0:2 * d]       # (H*N, 2D)  bf16  0/1 block-diag head mask for [K|V]
    seg_ones = consts_ref[:, 2 * d:3 * d]  # (H*N, H*N) bf16  per-head segment-sum matrix
    w_out = consts_ref[:, 3 * d:4 * d]     # (D, D)     bf16  attention output projection
    b_qkv = bias_ref[0:1, :]               # (1, 3D) f32  conv bias + 1/sqrt(hd) pre-folded
    b_out = bias_ref[1:2, 0:d]             # (1, D)  f32

    # ---- fused QKV of road = [static | conv(dynamic)]: two accumulating MXU matmuls ----
    # (conv-as-matmul is pre-folded into w_dyn; the '+' lets Mosaic accumulate in the MRB
    #  on v7x instead of popping two results and adding on the VPU)
    qkv = (jnp.dot(static_ref[...].astype(bf16), w_top, preferred_element_type=f32)
           + jnp.dot(xflat_ref[...].astype(bf16), w_dyn, preferred_element_type=f32)
           + b_qkv)                                                          # (N, 3D)

    q = qkv[:, 0:d].astype(bf16)           # 1/sqrt(hd) scale pre-folded into Q weights/bias
    kv = qkv[:, d:3 * d].astype(bf16)      # (N, 2D) bf16 — cast BEFORE the 8-way replication

    # ---- block-diagonal K/V: tile 8x along sublanes, zero off-head feature blocks ----
    kvbd = jnp.concatenate([kv] * h, axis=0) * mask_kv                      # (H*N, 2D) bf16
    kbd = kvbd[:, 0:d]                                                      # (H*N, D)
    vbd = kvbd[:, d:2 * d]                                                  # (H*N, D)

    # Output projection folded into the value path: (p @ vbd) @ Wo == p @ (vbd @ Wo).
    # vo is independent of the softmax, so this matmul sits off the critical path.
    vo = jnp.dot(vbd, w_out, preferred_element_type=f32).astype(bf16)       # (H*N, D)

    # ---- scores: one lane-dense matmul, contracting the feature axis of both operands.
    # kbd is kept in (H*N, D) row-major; if the lowering ever materializes a 128x128
    # transpose here, store the mask transposed and build kbd in (D, H*N) instead.
    s = jnp.einsum('nd,cd->nc', q, kbd, preferred_element_type=f32)         # (N, H*N)

    # ---- per-head softmax over each N-wide segment ----
    # Subtracting the global row max is exact (constant within every segment) and keeps
    # all exponents <= 0.
    s = s - jnp.max(s, axis=-1, keepdims=True)
    e = jnp.exp(s)
    denom = jnp.dot(e.astype(bf16), seg_ones, preferred_element_type=f32)   # (N, H*N)
    denom = jnp.maximum(denom, 1e-30)      # guard fully-underflowed segments (no inf/NaN)
    p = e * pl.reciprocal(denom, approx=True)

    # ---- attention output + (pre-folded) output projection: one final matmul ----
    out = jnp.dot(p.astype(bf16), vo, preferred_element_type=f32) + b_out   # (N, D)

    out_ref[0:n_roads, :] = out
    # special tokens: torch.arange(4).repeat(1, 128) -> rows of constant 0,1,2,3
    out_ref[n_roads:n_roads + 4, :] = (
        jax.lax.broadcasted_iota(jnp.int32, (4, d), 0).astype(f32))


def init_params(key, T, D):
    """Raw, torch-like parameters (Linear weights stored (in, out) here)."""
    ks = jax.random.split(key, 10)
    s = 0.02
    return {
        "conv_w": jax.random.normal(ks[0], (D, D, T), jnp.float32) * s,  # (out, in, k)
        "conv_b": jax.random.normal(ks[1], (D,), jnp.float32) * s,
        "wq": jax.random.normal(ks[2], (2 * D, D), jnp.float32) * s,
        "bq": jax.random.normal(ks[3], (D,), jnp.float32) * s,
        "wk": jax.random.normal(ks[4], (2 * D, D), jnp.float32) * s,
        "bk": jax.random.normal(ks[5], (D,), jnp.float32) * s,
        "wv": jax.random.normal(ks[6], (2 * D, D), jnp.float32) * s,
        "bv": jax.random.normal(ks[7], (D,), jnp.float32) * s,
        "wo": jax.random.normal(ks[8], (D, D), jnp.float32) * s,
        "bo": jax.random.normal(ks[9], (D,), jnp.float32) * s,
    }


def prepare_params(params, N, T, D):
    """One-time weight packing / constant building, hoisted out of the per-call path.

    Produces 3 arrays for the kernel:
      w_qkv  : (D + T*D, 3D) bf16  rows 0:D act on the static half; rows D: are the
                                   Conv1d weight folded through the dynamic half of Wqkv
                                   (valid because the conv output feeds ONLY the QKV
                                   projection); 1/sqrt(head_dim) folded into the Q cols.
      consts : (D, 4D)       bf16  [ block-diag head mask for [K|V] (2D) |
                                     per-head segment-sum matrix (D)    |
                                     output-projection weight (D) ]
      biases : (2, 3D)       f32   row0 = qkv bias (+ conv bias folded through W_bot),
                                   row1 = output-proj bias (zero-padded)
    """
    assert D == 128 and D % N_HEADS == 0 and N_HEADS * N == 128, (
        "block-diagonal head layout is tile-valid only for N=16, D=128, H=8")
    hd = D // N_HEADS
    hn = N_HEADS * N
    scale = 1.0 / (hd ** 0.5)

    # Conv1d weight (out=D, in=D, k=T) -> (T*D, D): row t*D+c multiplies
    # x_flat[:, t*D+c] = dynamic_emb[:, t, c]  (matches the NCL permute + conv).
    w_conv = jnp.transpose(params["conv_w"], (2, 1, 0)).reshape(T * D, D)

    w_qkv_full = jnp.concatenate(
        [params["wq"] * scale, params["wk"], params["wv"]], axis=1)          # (2D, 3D)
    w_top = w_qkv_full[:D]          # acts on the static half of the road embedding
    w_bot = w_qkv_full[D:]          # acts on the conv output (dynamic half)

    # Fold the conv weight AND bias through the dynamic half of Wqkv (f32, one time).
    w_dyn = w_conv @ w_bot                                                   # (T*D, 3D)
    b_qkv = (jnp.concatenate([params["bq"] * scale, params["bk"], params["bv"]])
             + params["conv_b"] @ w_bot)                                     # (3D,)

    # Precomputed bf16 0/1 constants (exactly representable in bf16).
    c_idx = jnp.arange(hn)
    f_idx = jnp.arange(D)
    head_mask = ((c_idx[:, None] // N) == (f_idx[None, :] // hd)).astype(jnp.bfloat16)
    mask_kv = jnp.concatenate([head_mask, head_mask], axis=1)                # (hn, 2D)
    seg_ones = ((c_idx[:, None] // N) == (c_idx[None, :] // N)).astype(jnp.bfloat16)

    consts = jnp.concatenate(
        [mask_kv, seg_ones, params["wo"].astype(jnp.bfloat16)], axis=1)      # (D, 4D)

    return {
        "w_qkv": jnp.concatenate([w_top, w_dyn], axis=0).astype(jnp.bfloat16),
        "consts": consts,
        "biases": jnp.stack([b_qkv, jnp.pad(params["bo"], (0, 2 * D))], axis=0),
    }


@jax.jit
def st_tokenizer(static_emb, dynamic_emb, packed):
    N, T, D = dynamic_emb.shape
    assert D == 128 and N_HEADS * N == 128, "kernel layout requires N=16, D=128, H=8"
    x_flat = dynamic_emb.reshape(N, T * D)   # contiguous flatten, effectively free

    vmem = pl.BlockSpec(memory_space=pltpu.MemorySpace.VMEM)
    return pl.pallas_call(
        st_tokenizer_kernel,
        out_shape=jax.ShapeDtypeStruct((N + 4, D), jnp.float32),
        in_specs=[vmem] * 5,
        out_specs=vmem,
    )(static_emb, x_flat, packed["w_qkv"], packed["consts"], packed["biases"])


if __name__ == "__main__":
    key = jax.random.PRNGKey(0)
    k_static, k_dyn, k_params = jax.random.split(key, 3)

    N, T, D = 16, 4, 128   # D=128 is structural (static emb dim, special_token repeat(1,128))

    static_emb = jax.random.normal(k_static, (N, D), jnp.float32)
    dynamic_emb = jax.random.normal(k_dyn, (N, T, D), jnp.float32)

    params = init_params(k_params, T, D)
    packed = prepare_params(params, N, T, D)    # one-time packing, outside the hot path

    out = st_tokenizer(static_emb, dynamic_emb, packed)
    jax.block_until_ready(out)

    assert out.shape == (N + 4, D) and out.dtype == jnp.float32
    print("KERNEL_OK")
</pallas_src>

<mosaic_0001>
module attributes {stable_mosaic.version = 11 : i64} {
  func.func @st_tokenizer_kernel(%arg0: memref<16x128xf32, #tpu.memory_space<vmem>>, %arg1: memref<16x512xf32, #tpu.memory_space<vmem>>, %arg2: memref<640x384xbf16, #tpu.memory_space<vmem>>, %arg3: memref<128x512xbf16, #tpu.memory_space<vmem>>, %arg4: memref<2x384xf32, #tpu.memory_space<vmem>>, %arg5: memref<20x128xf32, #tpu.memory_space<vmem>>) attributes {dimension_semantics = [], scalar_prefetch = 0 : i64, scratch_operands = 0 : i64, tpu.core_type = #tpu.core_type<tc>} {
    %c0 = arith.constant 0 : index
    %c0_0 = arith.constant 0 : index
    %0 = vector.load %arg2[%c0, %c0_0] : memref<640x384xbf16, #tpu.memory_space<vmem>>, vector<128x384xbf16>
    %c128 = arith.constant 128 : index
    %c0_1 = arith.constant 0 : index
    %1 = vector.load %arg2[%c128, %c0_1] : memref<640x384xbf16, #tpu.memory_space<vmem>>, vector<512x384xbf16>
    %c0_2 = arith.constant 0 : index
    %c0_3 = arith.constant 0 : index
    %2 = vector.load %arg3[%c0_2, %c0_3] : memref<128x512xbf16, #tpu.memory_space<vmem>>, vector<128x256xbf16>
    %c0_4 = arith.constant 0 : index
    %c256 = arith.constant 256 : index
    %3 = vector.load %arg3[%c0_4, %c256] : memref<128x512xbf16, #tpu.memory_space<vmem>>, vector<128x128xbf16>
    %c0_5 = arith.constant 0 : index
    %c384 = arith.constant 384 : index
    %4 = vector.load %arg3[%c0_5, %c384] : memref<128x512xbf16, #tpu.memory_space<vmem>>, vector<128x128xbf16>
    %c0_6 = arith.constant 0 : index
    %c0_7 = arith.constant 0 : index
    %5 = vector.load %arg4[%c0_6, %c0_7] : memref<2x384xf32, #tpu.memory_space<vmem>>, vector<1x384xf32>
    %c1 = arith.constant 1 : index
    %c0_8 = arith.constant 0 : index
    %6 = vector.load %arg4[%c1, %c0_8] : memref<2x384xf32, #tpu.memory_space<vmem>>, vector<1x128xf32>
    %c0_9 = arith.constant 0 : index
    %c0_10 = arith.constant 0 : index
    %7 = vector.load %arg0[%c0_9, %c0_10] : memref<16x128xf32, #tpu.memory_space<vmem>>, vector<16x128xf32>
    %8 = arith.truncf %7 : vector<16x128xf32> to vector<16x128xbf16>
    %cst = arith.constant dense<0.000000e+00> : vector<16x384xf32>
    %9 = tpu.matmul %8, %0, %cst {dimension_numbers = #tpu.dot_dimension_numbers<[1], [0], [0], [1], [0, 0, 1, 1], [], []>} : vector<16x128xbf16>, vector<128x384xbf16>, vector<16x384xf32> -> vector<16x384xf32>
    %c0_11 = arith.constant 0 : index
    %c0_12 = arith.constant 0 : index
    %10 = vector.load %arg1[%c0_11, %c0_12] : memref<16x512xf32, #tpu.memory_space<vmem>>, vector<16x512xf32>
    %11 = arith.truncf %10 : vector<16x512xf32> to vector<16x512xbf16>
    %cst_13 = arith.constant dense<0.000000e+00> : vector<16x384xf32>
    %12 = tpu.matmul %11, %1, %cst_13 {dimension_numbers = #tpu.dot_dimension_numbers<[1], [0], [0], [1], [0, 0, 1, 1], [], []>} : vector<16x512xbf16>, vector<512x384xbf16>, vector<16x384xf32> -> vector<16x384xf32>
    %13 = arith.addf %9, %12 : vector<16x384xf32>
    %14 = vector.broadcast %5 : vector<1x384xf32> to vector<16x384xf32>
    %15 = arith.addf %13, %14 : vector<16x384xf32>
    %16 = vector.extract_strided_slice %15 {offsets = [0, 0], sizes = [16, 128], strides = [1, 1]} : vector<16x384xf32> to vector<16x128xf32>
    %17 = arith.truncf %16 : vector<16x128xf32> to vector<16x128xbf16>
    %18 = vector.extract_strided_slice %15 {offsets = [0, 128], sizes = [16, 256], strides = [1, 1]} : vector<16x384xf32> to vector<16x256xf32>
    %19 = arith.truncf %18 : vector<16x256xf32> to vector<16x256xbf16>
    %20 = tpu.concatenate %19, %19, %19, %19, %19, %19, %19, %19 in 0 : vector<16x256xbf16>, vector<16x256xbf16>, vector<16x256xbf16>, vector<16x256xbf16>, vector<16x256xbf16>, vector<16x256xbf16>, vector<16x256xbf16>, vector<16x256xbf16> -> vector<128x256xbf16>
    %21 = arith.mulf %20, %2 : vector<128x256xbf16>
    %22 = vector.extract_strided_slice %21 {offsets = [0, 0], sizes = [128, 128], strides = [1, 1]} : vector<128x256xbf16> to vector<128x128xbf16>
    %23 = vector.extract_strided_slice %21 {offsets = [0, 128], sizes = [128, 128], strides = [1, 1]} : vector<128x256xbf16> to vector<128x128xbf16>
    %cst_14 = arith.constant dense<0.000000e+00> : vector<128x128xf32>
    %24 = tpu.matmul %23, %4, %cst_14 {dimension_numbers = #tpu.dot_dimension_numbers<[1], [0], [0], [1], [0, 0, 1, 1], [], []>} : vector<128x128xbf16>, vector<128x128xbf16>, vector<128x128xf32> -> vector<128x128xf32>
    %25 = arith.truncf %24 : vector<128x128xf32> to vector<128x128xbf16>
    "tpu.trace_start"() <{level = 10 : i32, message = "nd,cd->nc"}> : () -> ()
    %cst_15 = arith.constant dense<0.000000e+00> : vector<16x128xf32>
    %26 = tpu.matmul %17, %22, %cst_15 {dimension_numbers = #tpu.dot_dimension_numbers<[1], [1], [0], [0], [0, 0, 1, 0], [], []>} : vector<16x128xbf16>, vector<128x128xbf16>, vector<16x128xf32> -> vector<16x128xf32>
    "tpu.trace_stop"() : () -> ()
    %cst_16 = arith.constant dense<0xFF800000> : vector<16xf32>
    %27 = vector.multi_reduction <maximumf>, %26, %cst_16 [1] : vector<16x128xf32> to vector<16xf32>
    %28 = vector.shape_cast %27 : vector<16xf32> to vector<16x1xf32>
    %29 = vector.broadcast %28 : vector<16x1xf32> to vector<16x128xf32>
    %30 = arith.subf %26, %29 : vector<16x128xf32>
    %31 = math.exp %30 : vector<16x128xf32>
    %32 = arith.truncf %31 : vector<16x128xf32> to vector<16x128xbf16>
    %cst_17 = arith.constant dense<0.000000e+00> : vector<16x128xf32>
    %33 = tpu.matmul %32, %3, %cst_17 {dimension_numbers = #tpu.dot_dimension_numbers<[1], [0], [0], [1], [0, 0, 1, 1], [], []>} : vector<16x128xbf16>, vector<128x128xbf16>, vector<16x128xf32> -> vector<16x128xf32>
    %cst_18 = arith.constant 1.000000e-30 : f32
    %34 = vector.broadcast %cst_18 : f32 to vector<16x128xf32>
    %35 = arith.maximumf %33, %34 : vector<16x128xf32>
    %36 = tpu.reciprocal %35 {approx = true} : vector<16x128xf32> -> vector<16x128xf32>
    %37 = arith.mulf %31, %36 : vector<16x128xf32>
    %38 = arith.truncf %37 : vector<16x128xf32> to vector<16x128xbf16>
    %cst_19 = arith.constant dense<0.000000e+00> : vector<16x128xf32>
    %39 = tpu.matmul %38, %25, %cst_19 {dimension_numbers = #tpu.dot_dimension_numbers<[1], [0], [0], [1], [0, 0, 1, 1], [], []>} : vector<16x128xbf16>, vector<128x128xbf16>, vector<16x128xf32> -> vector<16x128xf32>
    %40 = vector.broadcast %6 : vector<1x128xf32> to vector<16x128xf32>
    %41 = arith.addf %39, %40 : vector<16x128xf32>
    %c0_20 = arith.constant 0 : index
    %c0_21 = arith.constant 0 : index
    %42 = vector.load %arg5[%c0_20, %c0_21] : memref<20x128xf32, #tpu.memory_space<vmem>>, vector<16x128xf32>
    tpu.vector_store %arg5[%c0_20, %c0_21], %41 {strides = array<i32>} : memref<20x128xf32, #tpu.memory_space<vmem>>, vector<16x128xf32>,
    %43 = tpu.iota {dimensions = array<i32: 0>} : vector<4x128xi32>
    %44 = arith.sitofp %43 : vector<4x128xi32> to vector<4x128xf32>
    %c16 = arith.constant 16 : index
    %c0_22 = arith.constant 0 : index
    %45 = vector.load %arg5[%c16, %c0_22] : memref<20x128xf32, #tpu.memory_space<vmem>>, vector<4x128xf32>
    tpu.vector_store %arg5[%c16, %c0_22], %44 {strides = array<i32>} : memref<20x128xf32, #tpu.memory_space<vmem>>, vector<4x128xf32>,
    return
  }
}

</mosaic_0001>

<bundles_post_ra>
// kernel: st_tokenizer.1
= control target key start
LH: loop header
LB: loop body
LE: loop exit
PB: predicated region body
PF: predicated region fallthrough
CT: control target
= control target key end

     0   :  { %10 = vsyncpa [#allocation3], 0  ;;  %s2503_s0 = inlined_call_operand.vmem [shape: f32[16,128], index: 0, kind: input, shape index: {}]   ;;  %s2504_s1 = inlined_call_operand.vmem [shape: f32[16,512], index: 1, kind: input, shape index: {}]   ;;  %s2505_s2 = inlined_call_operand.hbm [shape: bf16[640,384], index: 2, kind: input, shape index: {}]   ;;  %s2506_s3 = inlined_call_operand.hbm [shape: bf16[128,512], index: 3, kind: input, shape index: {}]   ;;  %s2507_s4 = inlined_call_operand.vmem [shape: f32[2,384], index: 4, kind: input, shape index: {}]   ;;  %s2508_s5 = inlined_call_operand.hbm [shape: f32[20,128], index: 5, kind: output, shape index: {}]  }
   0x1   :  { %11 = vsyncpa [#allocation6], 0 }
   0x2   :  { %12 = vsyncpa [#allocation4], 0  ;;  %s2319_s18 = smov [#allocation2]   ;;  %s2247_s22 = scalar_lea.hbm %s2505_s2, 15360 }
   0x3   :  { %s22_s19 = sshll.u32 %s2319_s18, 4  ;;  %p2248_p0 = scmp.ne.s32.totalorder %s2505_s2, %s2247_s22  ;;  %s23_s19 = int_to_ptr.vmem [resolvable:$true] %s22_s19 }
   0x4   :  { %p2251_p1 = scmp.lt.u32.totalorder %s2247_s22, %s2505_s2 }
   0x6   :  { %p2253_p2 = pnand %p2251_p1, %p2248_p0 }
   0x8   :  { %2256 = shalt.err (!%p2253_p2)
}
   0x9   :  { %s2257_s27 = scalar_lea.vmem %s23_s19, 15360  ;;  %p2262_p4 = scmp.lt.s32.totalorder %s23_s19, %s23_s19 }
   0xa   :  { %p2258_p3 = scmp.ne.s32.totalorder %s23_s19, %s2257_s27  ;;  %p2263_p5 = scmp.lt.s32.totalorder %s2257_s27, %s2257_s27 }
   0xc   :  { %p2264_p6 = por %p2263_p5, %p2262_p4 }
   0xe   :  { %p2265_p7 = pnand %p2264_p6, %p2258_p3 }
  0x10   :  { %2268 = shalt.err (!%p2265_p7)
}
  0x11   :  { %s2320_s28 = smov 192   ;;  %s2321_s29 = smov 12  }
  0x12   :  { %28 = dma.hbm_to_vmem [thread:$0]  %s2505_s2, 15360, %s23_s19, [#allocation3], %s2320_s28, %s2320_s28, %s2321_s29  }
  0x13   :  { %s2322_s7 = smov [#allocation5]   ;;  %s2269_s11 = scalar_lea.hbm %s2506_s3, 4096 }
  0x14   :  { %s34_s8 = sshll.u32 %s2322_s7, 4  ;;  %p2270_p8 = scmp.ne.s32.totalorder %s2506_s3, %s2269_s11  ;;  %s35_s8 = int_to_ptr.vmem [resolvable:$true] %s34_s8 }
  0x15   :  { %p2273_p9 = scmp.lt.u32.totalorder %s2269_s11, %s2506_s3 }
  0x17   :  { %p2275_p10 = pnand %p2273_p9, %p2270_p8 }
  0x19   :  { %2278 = shalt.err (!%p2275_p10)
}
  0x1a   :  { %s2279_s16 = scalar_lea.vmem %s35_s8, 4096  ;;  %p2284_p12 = scmp.lt.s32.totalorder %s35_s8, %s35_s8 }
  0x1b   :  { %p2280_p11 = scmp.ne.s32.totalorder %s35_s8, %s2279_s16  ;;  %p2285_p13 = scmp.lt.s32.totalorder %s2279_s16, %s2279_s16 }
  0x1d   :  { %p2286_p0 = por %p2285_p13, %p2284_p12 }
  0x1f   :  { %p2287_p1 = pnand %p2286_p0, %p2280_p11 }
  0x21   :  { %2290 = shalt.err (!%p2287_p1)
}
  0x22   :  { %s2323_s2 = smov 256   ;;  %s2324_s17 = smov 16  }
  0x23   :  { %40 = dma.hbm_to_vmem [thread:$0]  %s2506_s3, 4096, %s35_s8, [#allocation6], %s2323_s2, %s2323_s2, %s2324_s17  }
  0x24   :  { %2313 = dma.done.wait [#allocation3], 15360  }
  0x25   :  { %2314 = vsyncadd [#allocation3], 4294951936 }
  0x26   :  { %2315 = dma.done.wait [#allocation6], 4096  }
  0x27   :  { %2316 = vsyncadd [#allocation6], 4294963200  ;;  %v2039_v0 = vld [vmem:[#allocation2 + $0xc4] ss:$12 sps:$4 sm:$0xff]   ;;  %v2041_v1 = vld [vmem:[#allocation2 + $0x188] ss:$12 sps:$4 sm:$0xff]  }
  0x28   :  { %787 = vmatprep.subr.bf16.mxu0 %v2039_v0  ;;  %v2042_v2 = vld [vmem:[#allocation2 + $0xc0] ss:$12 sps:$4 sm:$0xff]   ;;  %1811 = vmatprep.subr.bf16.mxu1 %v2041_v1  ;;  %v2043_v3 = vld [vmem:[#allocation2 + $0xc8] ss:$12 sps:$4 sm:$0xff]   ;;  %v2047_v6 = vld [vmem:[#allocation2 + $0xd8] ss:$12 sps:$4 sm:$0xff]  }
  0x29   :  { %788 = vmatpush1.bf16.msra.mxu0 %v2042_v2  ;;  %v2044_v4 = vld [vmem:[#allocation2 + $0xdc] ss:$12 sps:$4 sm:$0xff]   ;;  %1812 = vmatpush3.bf16.msra.mxu1 %v2043_v3  ;;  %v2046_v5 = vld [vmem:[#allocation2 + $0x1a0] ss:$12 sps:$4 sm:$0xff]   ;;  %v2051_v9 = vld [vmem:[#allocation2 + $0x1b8] ss:$12 sps:$4 sm:$0xff]  }
  0x2a   :  { %789 = vmatprep.subr.bf16.mxu0 %v2044_v4  ;;  %v2048_v7 = vld [vmem:[#allocation2 + $0xe0] ss:$12 sps:$4 sm:$0xff]   ;;  %1813 = vmatprep.subr.bf16.mxu1 %v2046_v5  ;;  %v2052_v10 = vld [vmem:[#allocation2 + $0xf0] ss:$12 sps:$4 sm:$0xff]   ;;  %v2053_v11 = vld [vmem:[#allocation2 + $0xf8] ss:$12 sps:$4 sm:$0xff]  }
  0x2b   :  { %v2049_v8 = vld [vmem:[#allocation2 + $0xf4] ss:$12 sps:$4 sm:$0xff]   ;;  %v2054_v12 = vld [vmem:[#allocation2 + $0x10c] ss:$12 sps:$4 sm:$0xff]   ;;  %v2056_v13 = vld [vmem:[#allocation2 + $0x1d0] ss:$12 sps:$4 sm:$0xff]  }
  0x2c   :  { %v2057_v14 = vld [vmem:[#allocation2 + $0x108] ss:$12 sps:$4 sm:$0xff]   ;;  %v2058_v15 = vld [vmem:[#allocation2 + $0x110] ss:$12 sps:$4 sm:$0xff]   ;;  %v2062_v18 = vld [vmem:[#allocation2 + $0x120] ss:$12 sps:$4 sm:$0xff]  }
  0x2d   :  { %790 = vmatpush1.bf16.msra.mxu0 %v2047_v6  ;;  %1814 = vmatpush3.bf16.msra.mxu1 %v2048_v7  ;;  %v2059_v16 = vld [vmem:[#allocation2 + $0x124] ss:$12 sps:$4 sm:$0xff]   ;;  %v2061_v17 = vld [vmem:[#allocation2 + $0x1e8] ss:$12 sps:$4 sm:$0xff]   ;;  %v2066_v21 = vld [vmem:[#allocation2 + $0x200] ss:$12 sps:$4 sm:$0xff]  }
  0x2e   :  { %791 = vmatprep.subr.bf16.mxu0 %v2049_v8  ;;  %1815 = vmatprep.subr.bf16.mxu1 %v2051_v9  ;;  %v2063_v19 = vld [vmem:[#allocation2 + $0x128] ss:$12 sps:$4 sm:$0xff]   ;;  %v2067_v22 = vld [vmem:[#allocation2 + $0x138] ss:$12 sps:$4 sm:$0xff]   ;;  %v2068_v23 = vld [vmem:[#allocation2 + $0x140] ss:$12 sps:$4 sm:$0xff]  }
  0x2f   :  { %v2064_v20 = vld [vmem:[#allocation2 + $0x13c] ss:$12 sps:$4 sm:$0xff]   ;;  %v2069_v24 = vld [vmem:[#allocation2 + $0x154] ss:$12 sps:$4 sm:$0xff]   ;;  %v2071_v25 = vld [vmem:[#allocation2 + $0x218] ss:$12 sps:$4 sm:$0xff]  }
  0x30   :  { %v2072_v26 = vld [vmem:[#allocation2 + $0x150] ss:$12 sps:$4 sm:$0xff]   ;;  %v2073_v27 = vld [vmem:[#allocation2 + $0x158] ss:$12 sps:$4 sm:$0xff]   ;;  %v2077_v30 = vld [vmem:[#allocation2 + $0x168] ss:$12 sps:$4 sm:$0xff]  }
  0x31   :  { %792 = vmatpush1.bf16.msra.mxu0 %v2052_v10  ;;  %1816 = vmatpush3.bf16.msra.mxu1 %v2053_v11  ;;  %v2074_v28 = vld [vmem:[#allocation2 + $0x16c] ss:$12 sps:$4 sm:$0xff]   ;;  %v2076_v29 = vld [vmem:[#allocation2 + $0x230] ss:$12 sps:$4 sm:$0xff]   ;;  %v2081_v36 = vld [vmem:[#allocation2 + $0x308] ss:$12 sps:$4 sm:$0xff]  }
  0x32   :  { %793 = vmatprep.subr.bf16.mxu0 %v2054_v12  ;;  %1817 = vmatprep.subr.bf16.mxu1 %v2056_v13  ;;  %v2078_v31 = vld [vmem:[#allocation2 + $0x170] ss:$12 sps:$4 sm:$0xff]   ;;  %v264_v32 = vld [vmem:[%s2504_s1 + $0x8] sm:$0xff]  ;;  %v263_v37 = vld [vmem:[%s2504_s1] sm:$0xff]  ;;  %vm2326_vm0 = vmmov 0   ;;  %s2328_s16 = smov [#allocation7]  }
  0x33   :  { %v268_v33 = vld [vmem:[%s2504_s1 + $0x28] sm:$0xff]  ;;  %v2079_v34 = vld [vmem:[#allocation2 + $0x184] ss:$12 sps:$4 sm:$0xff]   ;;  %v2089_v46 = vld [vmem:[#allocation2 + $0x1b4] ss:$12 sps:$4 sm:$0xff]   ;;  %s1645_s2 = sshll.u32 %s2328_s16, 4  ;;  %s1646_s2 = int_to_ptr.vmem [resolvable:$true] %s1645_s2 }
  0x34   :  { %v272_v35 = vpack.c.bf16 %v268_v33, %v264_v32  ;;  %v267_v38 = vld [vmem:[%s2504_s1 + $0x20] sm:$0xff]  ;;  %v2083_v41 = vld [vmem:[#allocation2 + $0x248] ss:$12 sps:$4 sm:$0xff]   ;;  %v2092_v48 = vld [vmem:[#allocation2 + $0x1b0] ss:$12 sps:$4 sm:$0xff]   ;;  %s2291_s17 = scalar_lea.vmem %s1646_s2, 384  ;;  %p2296_p3 = scmp.lt.s32.totalorder %s1646_s2, %s1646_s2 }
  0x35   :  { %794 = vmatpush1.bf16.msra.mxu0 %v2057_v14  ;;  %1818 = vmatpush3.bf16.msra.mxu1 %v2058_v15  ;;  %v2082_v39 = vld [vmem:[#allocation2 + $0x180] ss:$12 sps:$4 sm:$0xff]   ;;  %v2397_v40 = vpack.c.bf16 %v267_v38, %v263_v37  ;;  %v2084_v42 = vld [vmem:[#allocation2 + $0x19c] ss:$12 sps:$4 sm:$0xff]   ;;  %v2087_v44 = vld [vmem:[#allocation2 + $0x198] ss:$12 sps:$4 sm:$0xff]   ;;  %p2292_p2 = scmp.ne.s32.totalorder %s1646_s2, %s2291_s17  ;;  %p2297_p4 = scmp.lt.s32.totalorder %s2291_s17, %s2291_s17 }
  0x36   :  { %795 = vmatprep.subr.bf16.mxu0 %v2059_v16  ;;  %1819 = vmatprep.subr.bf16.mxu1 %v2061_v17  ;;  %v2086_v43 = vld [vmem:[#allocation2 + $0x320] ss:$12 sps:$4 sm:$0xff]   ;;  %v2091_v47 = vld [vmem:[#allocation2 + $0x338] ss:$12 sps:$4 sm:$0xff]   ;;  %v2096_v51 = vld [vmem:[#allocation2 + $0x350] ss:$12 sps:$4 sm:$0xff]  }
  0x37   :  { %905 = vmatprep.mubr.bf16.mxu1 %v272_v35  ;;  %819 = vmatprep.mubr.bf16.mxu0 %v272_v35  ;;  %v2088_v45 = vld [vmem:[#allocation2 + $0x260] ss:$12 sps:$4 sm:$0xff]   ;;  %v2093_v49 = vld [vmem:[#allocation2 + $0x278] ss:$12 sps:$4 sm:$0xff]   ;;  %v2097_v52 = vld [vmem:[#allocation2 + $0x1c8] ss:$12 sps:$4 sm:$0xff]   ;;  %p2298_p5 = por %p2297_p4, %p2296_p3 }
  0x38   :  { %v2094_v50 = vld [vmem:[#allocation2 + $0x1cc] ss:$12 sps:$4 sm:$0xff]   ;;  %v2098_v53 = vld [vmem:[#allocation2 + $0x290] ss:$12 sps:$4 sm:$0xff]   ;;  %v2101_v55 = vld [vmem:[#allocation2 + $0x368] ss:$12 sps:$4 sm:$0xff]  }
  0x39   :  { %796 = vmatpush1.bf16.msra.mxu0 %v2062_v18  ;;  %1820 = vmatpush3.bf16.msra.mxu1 %v2063_v19  ;;  %v2099_v54 = vld [vmem:[#allocation2 + $0x1e4] ss:$12 sps:$4 sm:$0xff]   ;;  %v2102_v56 = vld [vmem:[#allocation2 + $0x1e0] ss:$12 sps:$4 sm:$0xff]   ;;  %v2103_v57 = vld [vmem:[#allocation2 + $0x2a8] ss:$12 sps:$4 sm:$0xff]   ;;  %p2299_p6 = pnand %p2298_p5, %p2292_p2 }
  0x3a   :  { %797 = vmatprep.subr.bf16.mxu0 %v2064_v20  ;;  %1821 = vmatprep.subr.bf16.mxu1 %v2066_v21  ;;  %v2104_v58 = vld [vmem:[#allocation2 + $0x1fc] ss:$12 sps:$4 sm:$0xff]   ;;  %v2106_v59 = vld [vmem:[#allocation2 + $0x380] ss:$12 sps:$4 sm:$0xff]   ;;  %v2107_v60 = vld [vmem:[#allocation2 + $0x1f8] ss:$12 sps:$4 sm:$0xff]  }
  0x3b   :  { %v2108_v61 = vld [vmem:[#allocation2 + $0x2c0] ss:$12 sps:$4 sm:$0xff]   ;;  %v2111_v63 = vld [vmem:[#allocation2 + $0x398] ss:$12 sps:$4 sm:$0xff]   ;;  %v2112_v0 = vld [vmem:[#allocation2 + $0x210] ss:$12 sps:$4 sm:$0xff]  }
  0x3c   :  { %v2109_v62 = vld [vmem:[#allocation2 + $0x214] ss:$12 sps:$4 sm:$0xff]   ;;  %v2113_v1 = vld [vmem:[#allocation2 + $0x2d8] ss:$12 sps:$4 sm:$0xff]   ;;  %v2116_v6 = vld [vmem:[#allocation2 + $0x3b0] ss:$12 sps:$4 sm:$0xff]  }
  0x3d   :  { %798 = vmatpush1.bf16.msra.mxu0 %v2067_v22  ;;  %1822 = vmatpush3.bf16.msra.mxu1 %v2068_v23  ;;  %v266_v2 = vld [vmem:[%s2504_s1 + $0x18] sm:$0xff]  ;;  %v2117_v7 = vld [vmem:[#allocation2 + $0x228] ss:$12 sps:$4 sm:$0xff]   ;;  %v2121_v9 = vld [vmem:[#allocation2 + $0x244] ss:$12 sps:$4 sm:$0xff]   ;;  %v2325_v16 = vmov 0.0  }
  0x3e   :  { %799 = vmatprep.subr.bf16.mxu0 %v2069_v24  ;;  %1823 = vmatprep.subr.bf16.mxu1 %v2071_v25  ;;  %v270_v3 = vld [vmem:[%s2504_s1 + $0x38] sm:$0xff]  ;;  %v265_v10 = vld [vmem:[%s2504_s1 + $0x10] sm:$0xff]  ;;  %v2119_v12 = vld [vmem:[#allocation2 + $0x240] ss:$12 sps:$4 sm:$0xff]  }
  0x3f   :  { %v2114_v4 = vld [vmem:[#allocation2 + $0x22c] ss:$12 sps:$4 sm:$0xff]   ;;  %v274_v5 = vpack.c.bf16 %v270_v3, %v266_v2  ;;  %v2118_v8 = vld [vmem:[#allocation2 + $0x2f0] ss:$12 sps:$4 sm:$0xff]   ;;  %v2122_v14 = vld [vmem:[#allocation2 + $0x8] ss:$12 sps:$4 sm:$0xff]  }
  0x40   :  { %v269_v11 = vld [vmem:[%s2504_s1 + $0x30] sm:$0xff]  ;;  %v2125_v15 = vld [vmem:[#allocation2 + $0x25c] ss:$12 sps:$4 sm:$0xff]   ;;  %v2123_v17 = vld [vmem:[#allocation2 + $0x258] ss:$12 sps:$4 sm:$0xff]  }
  0x41   :  { %800 = vmatpush1.bf16.msra.mxu0 %v2072_v26  ;;  %1824 = vmatpush3.bf16.msra.mxu1 %v2073_v27  ;;  %v2412_v13 = vpack.c.bf16 %v269_v11, %v265_v10  ;;  %v2126_v18 = vld [vmem:[#allocation2 + $0x20] ss:$12 sps:$4 sm:$0xff]   ;;  %v2127_v20 = vld [vmem:[#allocation2 + $0x270] ss:$12 sps:$4 sm:$0xff]   ;;  %v2130_v21 = vld [vmem:[#allocation2 + $0x38] ss:$12 sps:$4 sm:$0xff]  }
  0x42   :  { %801 = vmatprep.subr.bf16.mxu0 %v2074_v28  ;;  %1825 = vmatprep.subr.bf16.mxu1 %v2076_v29  ;;  %v2129_v19 = vld [vmem:[#allocation2 + $0x274] ss:$12 sps:$4 sm:$0xff]   ;;  %v2133_v22 = vld [vmem:[#allocation2 + $0x28c] ss:$12 sps:$4 sm:$0xff]   ;;  %v2134_v24 = vld [vmem:[#allocation2 + $0x50] ss:$12 sps:$4 sm:$0xff]  }
  0x43   :  { %v2131_v23 = vld [vmem:[#allocation2 + $0x288] ss:$12 sps:$4 sm:$0xff]   ;;  %v2137_v25 = vld [vmem:[#allocation2 + $0x2a4] ss:$12 sps:$4 sm:$0xff]   ;;  %v2135_v26 = vld [vmem:[#allocation2 + $0x2a0] ss:$12 sps:$4 sm:$0xff]  }
  0x44   :  { %v2138_v27 = vld [vmem:[#allocation2 + $0x68] ss:$12 sps:$4 sm:$0xff]   ;;  %v2139_v29 = vld [vmem:[#allocation2 + $0x2b8] ss:$12 sps:$4 sm:$0xff]   ;;  %v2143_v32 = vld [vmem:[#allocation2 + $0x2d0] ss:$12 sps:$4 sm:$0xff]  }
  0x45   :  { %802 = vmatpush1.bf16.msra.mxu0 %v2077_v30  ;;  %1826 = vmatpush3.bf16.msra.mxu1 %v2078_v31  ;;  %v2141_v28 = vld [vmem:[#allocation2 + $0x2bc] ss:$12 sps:$4 sm:$0xff]   ;;  %v2142_v30 = vld [vmem:[#allocation2 + $0x80] ss:$12 sps:$4 sm:$0xff]   ;;  %v2146_v33 = vld [vmem:[#allocation2 + $0x98] ss:$12 sps:$4 sm:$0xff]  }
  0x46   :  { %803 = vmatprep.subr.bf16.mxu0 %v2079_v34  ;;  %1833 = vmatprep.subr.bf16.mxu1 %v2081_v36  ;;  %v2145_v31 = vld [vmem:[#allocation2 + $0x2d4] ss:$12 sps:$4 sm:$0xff]   ;;  %v2149_v34 = vld [vmem:[#allocation2 + $0x2ec] ss:$12 sps:$4 sm:$0xff]   ;;  %v2150_v36 = vld [vmem:[#allocation2 + $0xb0] ss:$12 sps:$4 sm:$0xff]  }
  0x47   :  { %v2147_v35 = vld [vmem:[#allocation2 + $0x2e8] ss:$12 sps:$4 sm:$0xff]   ;;  %v2153_v37 = vld [vmem:[#allocation2 + $0x304] ss:$12 sps:$4 sm:$0xff]   ;;  %v2186_v3 = vld [vmem:[#allocation2 + $0x4c] ss:$12 sps:$4 sm:$0xff]  }
  0x48   :  { %906 = vmatmul.mubr.bf16.vlgmr.msra.gmra.mrb[0].mxu1 %v2397_v40  ;;  %v260_v38 = vld [vmem:[%s2503_s0] sm:$0xff]  ;;  %v2181_v2 = vld [vmem:[#allocation2 + $0x30] ss:$12 sps:$4 sm:$0xff]   ;;  %v2198_v11 = vld [vmem:[#allocation2 + $0xac] ss:$12 sps:$4 sm:$0xff]  }
  0x49   :  { %804 = vmatpush1.bf16.msra.mxu0 %v2082_v39  ;;  %1834 = vmatpush3.bf16.msra.mxu1 %v2083_v41  ;;  %v261_v39 = vld [vmem:[%s2503_s0 + $0x8] sm:$0xff]  ;;  %v2193_v10 = vld [vmem:[#allocation2 + $0x90] ss:$12 sps:$4 sm:$0xff]  }
  0x4a   :  { %805 = vmatprep.subr.bf16.mxu0 %v2084_v42  ;;  %1835 = vmatprep.subr.bf16.mxu1 %v2086_v43  ;;  %v2432_v41 = vpack.c.bf16 %v261_v39, %v260_v38  ;;  %v2156_v42 = vld [vmem:[#allocation2 + $0x31c] ss:$12 sps:$4 sm:$0xff]  }
  0x4b   :  { %946 = vmatprep.mubr.bf16.mxu1 %v274_v5  ;;  %v2199_v43 = vld [vmem:[#allocation5 + $0xc] ss:$16 sps:$4 sm:$0xff]  }
  0x4d   :  { %806 = vmatpush1.bf16.msra.mxu0 %v2087_v44  ;;  %1836 = vmatpush3.bf16.msra.mxu1 %v2088_v45  ;;  %v2154_v44 = vld [vmem:[#allocation2 + $0x318] ss:$12 sps:$4 sm:$0xff]   ;;  %v2200_v45 = vld [vmem:[#allocation5 + $0x2c] ss:$16 sps:$4 sm:$0xff]  }
  0x4e   :  { %807 = vmatprep.subr.bf16.mxu0 %v2089_v46  ;;  %1837 = vmatprep.subr.bf16.mxu1 %v2091_v47  ;;  %v2159_v46 = vld [vmem:[#allocation2 + $0x334] ss:$12 sps:$4 sm:$0xff]   ;;  %v2201_v47 = vld [vmem:[#allocation5 + $0x4c] ss:$16 sps:$4 sm:$0xff]  }
  0x51   :  { %808 = vmatpush1.bf16.msra.mxu0 %v2092_v48  ;;  %1838 = vmatpush3.bf16.msra.mxu1 %v2093_v49  ;;  %v2157_v48 = vld [vmem:[#allocation2 + $0x330] ss:$12 sps:$4 sm:$0xff]   ;;  %v2162_v49 = vld [vmem:[#allocation2 + $0x34c] ss:$12 sps:$4 sm:$0xff]  }
  0x52   :  { %809 = vmatprep.subr.bf16.mxu0 %v2094_v50  ;;  %1839 = vmatprep.subr.bf16.mxu1 %v2096_v51  ;;  %v2160_v50 = vld [vmem:[#allocation2 + $0x348] ss:$12 sps:$4 sm:$0xff]   ;;  %v2165_v51 = vld [vmem:[#allocation2 + $0x364] ss:$12 sps:$4 sm:$0xff]  }
  0x55   :  { %810 = vmatpush1.bf16.msra.mxu0 %v2097_v52  ;;  %1840 = vmatpush3.bf16.msra.mxu1 %v2098_v53  ;;  %v2163_v52 = vld [vmem:[#allocation2 + $0x360] ss:$12 sps:$4 sm:$0xff]   ;;  %v2168_v53 = vld [vmem:[#allocation2 + $0x37c] ss:$12 sps:$4 sm:$0xff]  }
  0x56   :  { %811 = vmatprep.subr.bf16.mxu0 %v2099_v54  ;;  %1841 = vmatprep.subr.bf16.mxu1 %v2101_v55  ;;  %v2166_v54 = vld [vmem:[#allocation2 + $0x378] ss:$12 sps:$4 sm:$0xff]   ;;  %v2171_v55 = vld [vmem:[#allocation2 + $0x394] ss:$12 sps:$4 sm:$0xff]  }
  0x59   :  { %812 = vmatpush1.bf16.msra.mxu0 %v2102_v56  ;;  %1842 = vmatpush3.bf16.msra.mxu1 %v2103_v57  ;;  %v2169_v56 = vld [vmem:[#allocation2 + $0x390] ss:$12 sps:$4 sm:$0xff]   ;;  %v2174_v57 = vld [vmem:[#allocation2 + $0x3ac] ss:$12 sps:$4 sm:$0xff]  }
  0x5a   :  { %813 = vmatprep.subr.bf16.mxu0 %v2104_v58  ;;  %1843 = vmatprep.subr.bf16.mxu1 %v2106_v59  ;;  %v2202_v58 = vld [vmem:[#allocation5 + $0x6c] ss:$16 sps:$4 sm:$0xff]   ;;  %v2172_v59 = vld [vmem:[#allocation2 + $0x3a8] ss:$12 sps:$4 sm:$0xff]  }
  0x5d   :  { %814 = vmatpush1.bf16.msra.mxu0 %v2107_v60  ;;  %1844 = vmatpush3.bf16.msra.mxu1 %v2108_v61  ;;  %v2177_v60 = vld [vmem:[#allocation2 + $0x4] ss:$12 sps:$4 sm:$0xff]   ;;  %v2175_v61 = vld [vmem:[#allocation2] ss:$12 sps:$4 sm:$0xff]  }
  0x5e   :  { %815 = vmatprep.subr.bf16.mxu0 %v2109_v62  ;;  %1845 = vmatprep.subr.bf16.mxu1 %v2111_v63  ;;  %v2180_v62 = vld [vmem:[#allocation2 + $0x1c] ss:$12 sps:$4 sm:$0xff]   ;;  %v2178_v63 = vld [vmem:[#allocation2 + $0x18] ss:$12 sps:$4 sm:$0xff]  }
  0x61   :  { %816 = vmatpush1.bf16.msra.mxu0 %v2112_v0  ;;  %1846 = vmatpush3.bf16.msra.mxu1 %v2113_v1  ;;  %v2327_v0 = vmov 0   ;;  %v2183_v1 = vld [vmem:[#allocation2 + $0x34] ss:$12 sps:$4 sm:$0xff]  }
  0x62   :  { %817 = vmatprep.subr.bf16.mxu0 %v2114_v4  ;;  %1847 = vmatprep.subr.bf16.mxu1 %v2116_v6  ;;  %v2184_v4 = vld [vmem:[#allocation2 + $0x48] ss:$12 sps:$4 sm:$0xff]   ;;  %v2187_v6 = vld [vmem:[#allocation2 + $0x60] ss:$12 sps:$4 sm:$0xff]  }
  0x65   :  { %818 = vmatpush1.bf16.msra.mxu0 %v2117_v7  ;;  %1848 = vmatpush3.bf16.msra.mxu1 %v2118_v8  ;;  %v2192_v7 = vld [vmem:[#allocation2 + $0x7c] ss:$12 sps:$4 sm:$0xff]   ;;  %v2190_v8 = vld [vmem:[#allocation2 + $0x78] ss:$12 sps:$4 sm:$0xff]  }
  0x66   :  { %830 = vmatprep.subr.bf16.mxu0 %v2121_v9  ;;  %1907 = vmatprep.subr.bf16.mxu1 %v2325_v16  ;;  %v2195_v9 = vld [vmem:[#allocation2 + $0x94] ss:$12 sps:$4 sm:$0xff]  }
  0x68   :  { %820 = vmatmul.mubr.bf16.vlgmr.msra.gmra.mrb[0].mxu0 %v2397_v40  ;;  %947 = vmatmul.mubr.bf16.vlgmr.msra.gmra.mrb[4].mxu1 %v2412_v13  ;;  %v2151_v40 = vld [vmem:[#allocation2 + $0x300] ss:$12 sps:$4 sm:$0xff]  }
  0x69   :  { %831 = vmatpush1.bf16.msra.mxu0 %v2119_v12  ;;  %1908 = vmatpush3.bf16.msra.mxu1 %v2122_v14  ;;  %v2203_v12 = vld [vmem:[#allocation5 + $0x8c] ss:$16 sps:$4 sm:$0xff]  }
  0x6a   :  { %832 = vmatprep.subr.bf16.mxu0 %v2125_v15  ;;  %1909 = vmatprep.subr.bf16.mxu1 %v2325_v16  ;;  %v2204_v14 = vld [vmem:[#allocation5 + $0xac] ss:$16 sps:$4 sm:$0xff]  }
  0x6b   :  { %1923 = vmatprep.mubr.msk.bf16.mxu1 %vm2326_vm0, %v2325_v16  ;;  %862 = vmatprep.mubr.bf16.mxu0 %v274_v5  ;;  %v2189_v5 = vld [vmem:[#allocation2 + $0x64] ss:$12 sps:$4 sm:$0xff]   ;;  %v2205_v15 = vld [vmem:[#allocation5 + $0xcc] ss:$16 sps:$4 sm:$0xff]  }
  0x6d   :  { %833 = vmatpush1.bf16.msra.mxu0 %v2123_v17  ;;  %1910 = vmatpush3.bf16.msra.mxu1 %v2126_v18  ;;  %v2206_v17 = vld [vmem:[#allocation5 + $0xec] ss:$16 sps:$4 sm:$0xff]  }
  0x6e   :  { %834 = vmatprep.subr.bf16.mxu0 %v2129_v19  ;;  %1911 = vmatprep.subr.bf16.mxu1 %v2325_v16 }
  0x71   :  { %835 = vmatpush1.bf16.msra.mxu0 %v2127_v20  ;;  %1912 = vmatpush3.bf16.msra.mxu1 %v2130_v21 }
  0x72   :  { %836 = vmatprep.subr.bf16.mxu0 %v2133_v22  ;;  %1913 = vmatprep.subr.bf16.mxu1 %v2325_v16 }
  0x75   :  { %837 = vmatpush1.bf16.msra.mxu0 %v2131_v23  ;;  %1914 = vmatpush3.bf16.msra.mxu1 %v2134_v24 }
  0x76   :  { %838 = vmatprep.subr.bf16.mxu0 %v2137_v25  ;;  %1915 = vmatprep.subr.bf16.mxu1 %v2325_v16 }
  0x79   :  { %839 = vmatpush1.bf16.msra.mxu0 %v2135_v26  ;;  %1916 = vmatpush3.bf16.msra.mxu1 %v2138_v27 }
  0x7a   :  { %840 = vmatprep.subr.bf16.mxu0 %v2141_v28  ;;  %1917 = vmatprep.subr.bf16.mxu1 %v2325_v16 }
  0x7d   :  { %841 = vmatpush1.bf16.msra.mxu0 %v2139_v29  ;;  %1918 = vmatpush3.bf16.msra.mxu1 %v2142_v30 }
  0x7e   :  { %842 = vmatprep.subr.bf16.mxu0 %v2145_v31  ;;  %1919 = vmatprep.subr.bf16.mxu1 %v2325_v16 }
  0x81   :  { %843 = vmatpush1.bf16.msra.mxu0 %v2143_v32  ;;  %1920 = vmatpush3.bf16.msra.mxu1 %v2146_v33  ;;  %v1168_v32 = vlaneseq }
  0x82   :  { %844 = vmatprep.subr.bf16.mxu0 %v2149_v34  ;;  %1921 = vmatprep.subr.bf16.mxu1 %v2325_v16 }
  0x83   :  { %v2441_v33 = vshrl.u32 %v1168_v32, 7 }
  0x85   :  { %845 = vmatpush1.bf16.msra.mxu0 %v2147_v35  ;;  %1922 = vmatpush3.bf16.msra.mxu1 %v2150_v36  ;;  %v1178_v34 = vsub.s32 2, %v2441_v33  ;;  %v258_v35 = vld [vmem:[%s2507_s4] ss:$2 sm:$0x7] }
  0x86   :  { %846 = vmatprep.subr.bf16.mxu0 %v2153_v37  ;;  %1927 = vmatprep.subr.bf16.mxu1 %v2199_v43 }
  0x87   :  { %v1179_v36 = vrot.slane %v258_v35, %v1178_v34 }
  0x88   :  { %1924 = vmatmul.mubr.bf16.vlgmr.msra.gmra.mrb[8].mxu1 %v2432_v41 }
  0x89   :  { %847 = vmatpush1.bf16.msra.mxu0 %v2151_v40  ;;  %1928 = vmatpush3.bf16.msra.mxu1 %v2199_v43 }
  0x8a   :  { %848 = vmatprep.subr.bf16.mxu0 %v2156_v42  ;;  %1929 = vmatprep.subr.bf16.mxu1 %v2200_v45 }
  0x8d   :  { %849 = vmatpush1.bf16.msra.mxu0 %v2154_v44  ;;  %1930 = vmatpush3.bf16.msra.mxu1 %v2200_v45  ;;  %v2209_v45 = vld [vmem:[#allocation5 + $0x4] ss:$16 sps:$4 sm:$0xff]  }
  0x8e   :  { %850 = vmatprep.subr.bf16.mxu0 %v2159_v46  ;;  %1931 = vmatprep.subr.bf16.mxu1 %v2201_v47  ;;  %v2210_v46 = vld [vmem:[#allocation5 + $0x24] ss:$16 sps:$4 sm:$0xff]  }
  0x91   :  { %851 = vmatpush1.bf16.msra.mxu0 %v2157_v48  ;;  %1932 = vmatpush3.bf16.msra.mxu1 %v2201_v47  ;;  %v2214_v47 = vld [vmem:[#allocation5 + $0x44] ss:$16 sps:$4 sm:$0xff]  }
  0x92   :  { %852 = vmatprep.subr.bf16.mxu0 %v2162_v49  ;;  %1933 = vmatprep.subr.bf16.mxu1 %v2202_v58 }
  0x95   :  { %853 = vmatpush1.bf16.msra.mxu0 %v2160_v50  ;;  %1934 = vmatpush3.bf16.msra.mxu1 %v2202_v58 }
  0x96   :  { %854 = vmatprep.subr.bf16.mxu0 %v2165_v51  ;;  %1935 = vmatprep.subr.bf16.mxu1 %v2203_v12 }
  0x99   :  { %855 = vmatpush1.bf16.msra.mxu0 %v2163_v52  ;;  %1936 = vmatpush3.bf16.msra.mxu1 %v2203_v12  ;;  %v2217_v52 = vld [vmem:[#allocation5 + $0x64] ss:$16 sps:$4 sm:$0xff]  }
  0x9a   :  { %856 = vmatprep.subr.bf16.mxu0 %v2168_v53  ;;  %1937 = vmatprep.subr.bf16.mxu1 %v2204_v14  ;;  %v2220_v53 = vld [vmem:[#allocation5 + $0x84] ss:$16 sps:$4 sm:$0xff]  }
  0x9d   :  { %857 = vmatpush1.bf16.msra.mxu0 %v2166_v54  ;;  %1938 = vmatpush3.bf16.msra.mxu1 %v2204_v14  ;;  %v2230_v14 = vld [vmem:[#allocation5 + $0x20] ss:$16 sps:$4 sm:$0xff]  }
  0x9e   :  { %858 = vmatprep.subr.bf16.mxu0 %v2171_v55  ;;  %1939 = vmatprep.subr.bf16.mxu1 %v2205_v15 }
  0xa1   :  { %859 = vmatpush1.bf16.msra.mxu0 %v2169_v56  ;;  %1940 = vmatpush3.bf16.msra.mxu1 %v2205_v15  ;;  %v2223_v56 = vld [vmem:[#allocation5 + $0xa4] ss:$16 sps:$4 sm:$0xff]  }
  0xa2   :  { %860 = vmatprep.subr.bf16.mxu0 %v2174_v57  ;;  %1941 = vmatprep.subr.bf16.mxu1 %v2206_v17  ;;  %v2226_v57 = vld [vmem:[#allocation5 + $0xc4] ss:$16 sps:$4 sm:$0xff]  }
  0xa5   :  { %861 = vmatpush1.bf16.msra.mxu0 %v2172_v59  ;;  %1942 = vmatpush3.bf16.msra.mxu1 %v2206_v17  ;;  %v2212_v17 = vld [vmem:[#allocation5 + $0x40] ss:$16 sps:$4 sm:$0xff]  }
  0xa6   :  { %1083 = vmatprep.subr.bf16.mxu0 %v2177_v60  ;;  %1959 = vmatprep.subr.bf16.mxu1 %v2325_v16  ;;  %v2229_v60 = vld [vmem:[#allocation5 + $0xe4] ss:$16 sps:$4 sm:$0xff]  }
  0xa8   :  { %863 = vmatmul.mubr.bf16.vlgmr.msra.gmra.mrb[0].mxu0 %v2412_v13  ;;  %v2196_v13 = vld [vmem:[#allocation2 + $0xa8] ss:$12 sps:$4 sm:$0xff]  }
  0xa9   :  { %1084 = vmatpush1.bf16.msra.mxu0 %v2175_v61  ;;  %1115 = vmatprep.mubr.bf16.mxu0 %v2327_v0 }
  0xaa   :  { %1085 = vmatprep.subr.bf16.mxu0 %v2180_v62  ;;  %v1170_v62 = vsub.s32 0, %v2441_v33 }
  0xac   :  { %v1171_v0 = vrot.slane %v258_v35, %v1170_v62  ;;  %v2235_v62 = vld [vmem:[#allocation5 + $0x88] ss:$16 sps:$4 sm:$0xff]  }
  0xad   :  { %1086 = vmatpush1.bf16.msra.mxu0 %v2178_v63  ;;  %v1174_v63 = vsub.s32 1, %v2441_v33 }
  0xae   :  { %1087 = vmatprep.subr.bf16.mxu0 %v2183_v1 }
  0xb1   :  { %1088 = vmatpush1.bf16.msra.mxu0 %v2181_v2  ;;  %v1175_v2 = vrot.slane %v258_v35, %v1174_v63  ;;  %v2236_v63 = vld [vmem:[#allocation5 + $0xa8] ss:$16 sps:$4 sm:$0xff]  }
  0xb2   :  { %1089 = vmatprep.subr.bf16.mxu0 %v2186_v3 }
  0xb5   :  { %1090 = vmatpush1.bf16.msra.mxu0 %v2184_v4 }
  0xb6   :  { %1091 = vmatprep.subr.bf16.mxu0 %v2189_v5 }
  0xb9   :  { %1092 = vmatpush1.bf16.msra.mxu0 %v2187_v6 }
  0xba   :  { %1093 = vmatprep.subr.bf16.mxu0 %v2192_v7 }
  0xbd   :  { %1094 = vmatpush1.bf16.msra.mxu0 %v2190_v8  ;;  %v2207_v8 = vld [vmem:[#allocation5] ss:$16 sps:$4 sm:$0xff]  }
  0xbe   :  { %1095 = vmatprep.subr.bf16.mxu0 %v2195_v9 }
  0xc1   :  { %1096 = vmatpush1.bf16.msra.mxu0 %v2193_v10 }
  0xc2   :  { %1097 = vmatprep.subr.bf16.mxu0 %v2198_v11 }
  0xc5   :  { %1098 = vmatpush1.bf16.msra.mxu0 %v2196_v13 }
  0xc6   :  { %1979 = vmatprep.subr.bf16.mxu0 %v2325_v16 }
  0xc8   :  { %1116 = vmatmul.mubr.bf16.vlgmr.msra.gmra.mrb[0].mxu0 %v2432_v41 }
  0xc9   :  { %1995 = vmatprep.mubr.msk.bf16.mxu0 %vm2326_vm0, %v2325_v16 }
 0x11b   :  { %v1827_v18 = vpop.f32.mrb[0].mxu1 }
 0x11c   :  { %v1828_v19 = vpop.f32.mrb[1].mxu1 }
 0x11d   :  { %v1829_v20 = vadd.f32 %v1828_v19, %v1827_v18  ;;  %v1830_v21 = vpop.f32.mrb[2].mxu1  ;;  %v2215_v19 = vld [vmem:[#allocation5 + $0x60] ss:$16 sps:$4 sm:$0xff]  }
 0x11e   :  { %v1831_v22 = vpop.f32.mrb[3].mxu1 }
 0x11f   :  { %v1832_v23 = vadd.f32 %v1831_v22, %v1830_v21  ;;  %v2218_v21 = vld [vmem:[#allocation5 + $0x80] ss:$16 sps:$4 sm:$0xff]  }
 0x13b   :  { %v1849_v24 = vpop.f32.mrb[4].mxu1 }
 0x13c   :  { %v1850_v25 = vpop.f32.mrb[5].mxu1 }
 0x13d   :  { %v1851_v26 = vadd.f32 %v1850_v25, %v1849_v24  ;;  %v1852_v27 = vpop.f32.mrb[6].mxu1  ;;  %v2224_v25 = vld [vmem:[#allocation5 + $0xc0] ss:$16 sps:$4 sm:$0xff]  }
 0x13e   :  { %v1853_v28 = vpop.f32.mrb[7].mxu1 }
 0x13f   :  { %v1854_v29 = vadd.f32 %v1853_v28, %v1852_v27  ;;  %v949_v30 = vadd.f32 %v1851_v26, %v1829_v20  ;;  %v2227_v27 = vld [vmem:[#allocation5 + $0xe0] ss:$16 sps:$4 sm:$0xff]  }
 0x141   :  { %v952_v31 = vadd.f32 %v1854_v29, %v1832_v23  ;;  %v2221_v23 = vld [vmem:[#allocation5 + $0xa0] ss:$16 sps:$4 sm:$0xff]  }
 0x15b   :  { %v1160_v37 = vpop.f32.mrb[8].mxu1 }
 0x15c   :  { %v1161_v38 = vadd.f32 %v1160_v37, %v949_v30  ;;  %v1925_v39 = vpop.f32.mrb[9].mxu1 }
 0x15d   :  { %v1163_v40 = vpop.f32.mrb[10].mxu1 }
 0x15e   :  { %v1185_v41 = vadd.f32 %v1179_v36, %v1161_v38  ;;  %v1164_v42 = vadd.f32 %v1163_v40, %v952_v31  ;;  %v1926_v43 = vpop.f32.mrb[11].mxu1  ;;  %v2231_v31 = vld [vmem:[#allocation5 + $0x8] ss:$16 sps:$4 sm:$0xff]  }
 0x15f   :  { %1980 = vmatpush3.bf16.msra.mxu0 %v2231_v31  ;;  %v2233_v38 = vld [vmem:[#allocation5 + $0x48] ss:$16 sps:$4 sm:$0xff]  }
 0x160   :  { %v1188_v44 = vadd.f32 %v1179_v36, %v1164_v42  ;;  %v2232_v36 = vld [vmem:[#allocation5 + $0x28] ss:$16 sps:$4 sm:$0xff]   ;;  %1981 = vmatprep.subr.bf16.mxu0 %v2325_v16 }
 0x162   :  { %v1191_v48 = vpack.c.bf16 %v1188_v44, %v1185_v41 }
 0x163   :  { %1982 = vmatpush3.bf16.msra.mxu0 %v2232_v36 }
 0x164   :  { %v1273_v49 = vmul.bf16 %v2209_v45, %v1191_v48  ;;  %v1275_v50 = vmul.bf16 %v2210_v46, %v1191_v48  ;;  %v1277_v51 = vmul.bf16 %v2214_v47, %v1191_v48  ;;  %v1279_v54 = vmul.bf16 %v2217_v52, %v1191_v48  ;;  %1983 = vmatprep.subr.bf16.mxu0 %v2325_v16 }
 0x165   :  { %v1281_v55 = vmul.bf16 %v2220_v53, %v1191_v48  ;;  %v1283_v58 = vmul.bf16 %v2223_v56, %v1191_v48  ;;  %v1285_v59 = vmul.bf16 %v2226_v57, %v1191_v48  ;;  %v1287_v61 = vmul.bf16 %v2229_v60, %v1191_v48 }
 0x166   :  { %1943 = vmatprep.mubr.bf16.mxu1 %v1273_v49 }
 0x167   :  { %1944 = vmatmul.mubr.bf16.vlgmr.msra.gmra.mrb[12].mxu1 %v1275_v50  ;;  %1984 = vmatpush3.bf16.msra.mxu0 %v2233_v38 }
 0x168   :  { %1947 = vmatprep.mubr.bf16.mxu1 %v1277_v51  ;;  %1985 = vmatprep.subr.bf16.mxu0 %v2325_v16 }
 0x16f   :  { %1948 = vmatmul.mubr.bf16.gmra.mrb[16].mxu1 %v1279_v54 }
 0x170   :  { %1951 = vmatprep.mubr.bf16.mxu1 %v1281_v55 }
 0x177   :  { %1952 = vmatmul.mubr.bf16.gmra.mrb[20].mxu1 %v1283_v58 }
 0x178   :  { %1955 = vmatprep.mubr.bf16.mxu1 %v1285_v59 }
 0x17f   :  { %1956 = vmatmul.mubr.bf16.gmra.mrb[24].mxu1 %v1287_v61  ;;  %v2234_v61 = vld [vmem:[#allocation5 + $0x68] ss:$16 sps:$4 sm:$0xff]  }
 0x180   :  { %1975 = vmatprep.mubr.msk.bf16.mxu1 %vm2326_vm0, %v2325_v16  ;;  %1986 = vmatpush3.bf16.msra.mxu0 %v2234_v61 }
 0x181   :  { %1987 = vmatprep.subr.bf16.mxu0 %v2325_v16 }
 0x184   :  { %1988 = vmatpush3.bf16.msra.mxu0 %v2235_v62 }
 0x185   :  { %1989 = vmatprep.subr.bf16.mxu0 %v2325_v16 }
 0x188   :  { %1990 = vmatpush3.bf16.msra.mxu0 %v2236_v63 }
 0x189   :  { %1991 = vmatprep.subr.bf16.mxu0 %v2325_v16 }
 0x19b   :  { %v1117_v1 = vpop.f32.mrb[0].mxu0 }
 0x19c   :  { %v1183_v3 = vadd.f32 %v1171_v0, %v1117_v1  ;;  %v1119_v4 = vpop.f32.mrb[1].mxu0  ;;  %v2238_v1 = vld [vmem:[#allocation5 + $0xe8] ss:$16 sps:$4 sm:$0xff]  }
 0x19d   :  { %v1121_v5 = vpop.f32.mrb[2].mxu0  ;;  %v1184_v9 = vadd.f32 %v1175_v2, %v1119_v4 }
 0x19e   :  { %v1186_v6 = vadd.f32 %v1171_v0, %v1121_v5  ;;  %v1123_v7 = vpop.f32.mrb[3].mxu0  ;;  %v2237_v0 = vld [vmem:[#allocation5 + $0xc8] ss:$16 sps:$4 sm:$0xff]  }
 0x19f   :  { %v1187_v10 = vadd.f32 %v1175_v2, %v1123_v7  ;;  %1992 = vmatpush3.bf16.msra.mxu0 %v2237_v0 }
 0x1a0   :  { %v1189_v11 = vpack.c.bf16 %v1186_v6, %v1183_v3  ;;  %1993 = vmatprep.subr.bf16.mxu0 %v2325_v16 }
 0x1a1   :  { %v1190_v12 = vpack.c.bf16 %v1187_v10, %v1184_v9 }
 0x1a3   :  { %v1272_v13 = vmul.bf16 %v2207_v8, %v1190_v12  ;;  %v1274_v15 = vmul.bf16 %v2230_v14, %v1190_v12  ;;  %v1276_v18 = vmul.bf16 %v2212_v17, %v1190_v12  ;;  %v1278_v20 = vmul.bf16 %v2215_v19, %v1190_v12  ;;  %1994 = vmatpush3.bf16.msra.mxu0 %v2238_v1 }
 0x1a4   :  { %v1280_v22 = vmul.bf16 %v2218_v21, %v1190_v12  ;;  %v1282_v24 = vmul.bf16 %v2221_v23, %v1190_v12  ;;  %v1284_v26 = vmul.bf16 %v2224_v25, %v1190_v12  ;;  %v1286_v28 = vmul.bf16 %v2227_v27, %v1190_v12  ;;  %1999 = vmatprep.subr.bf16.mxu0 %v2325_v16 }
 0x1a5   :  { %1960 = vmatpush3.bf16.xpose.msra.mxu1 %v1272_v13  ;;  %v1638_v23 = vcvt.s32.f32 %v2441_v33 }
 0x1a6   :  { %1961 = vmatprep.subr.bf16.mxu1 %v2325_v16 }
 0x1a7   :  { %1639 = vst [vmem:[#allocation7 + $0x10] sm:$0xf] %v1638_v23 }
 0x1ad   :  { %1962 = vmatpush3.bf16.xpose.msra.mxu1 %v1274_v15 }
 0x1ae   :  { %1963 = vmatprep.subr.bf16.mxu1 %v2325_v16 }
 0x1b5   :  { %1964 = vmatpush3.bf16.xpose.msra.mxu1 %v1276_v18 }
 0x1b6   :  { %1965 = vmatprep.subr.bf16.mxu1 %v2325_v16 }
 0x1bd   :  { %1966 = vmatpush3.bf16.xpose.msra.mxu1 %v1278_v20 }
 0x1be   :  { %1967 = vmatprep.subr.bf16.mxu1 %v2325_v16 }
 0x1c5   :  { %1968 = vmatpush3.bf16.xpose.msra.mxu1 %v1280_v22 }
 0x1c6   :  { %1969 = vmatprep.subr.bf16.mxu1 %v2325_v16 }
 0x1cd   :  { %1970 = vmatpush3.bf16.xpose.msra.mxu1 %v1282_v24 }
 0x1ce   :  { %1971 = vmatprep.subr.bf16.mxu1 %v2325_v16 }
 0x1d5   :  { %1972 = vmatpush3.bf16.xpose.msra.mxu1 %v1284_v26 }
 0x1d6   :  { %1973 = vmatprep.subr.bf16.mxu1 %v2325_v16 }
 0x1dd   :  { %1974 = vmatpush3.bf16.xpose.msra.mxu1 %v1286_v28 }
 0x1e4   :  { %1976 = vmatmul.mubr.bf16.vlgmr.msra.gmra.mrb[28].mxu1 %v1189_v11 }
 0x23a   :  { %v2458_v29 = vpop.f32.mrb[12].mxu1 }
 0x23b   :  { %v2460_v30 = vpop.f32.mrb[13].mxu1 }
 0x23c   :  { %v2462_v32 = vpop.f32.mrb[14].mxu1 }
 0x23d   :  { %v1434_v34 = vpack.c.bf16 %v2462_v32, %v2458_v29  ;;  %v1373_v35 = vpop.f32.mrb[15].mxu1 }
 0x23e   :  { %v1433_v37 = vpack.c.bf16 %v1373_v35, %v2460_v30 }
 0x242   :  { %v1949_v39 = vpop.f32.mrb[16].mxu1 }
 0x243   :  { %v1386_v40 = vpop.f32.mrb[17].mxu1 }
 0x244   :  { %v1950_v41 = vpop.f32.mrb[18].mxu1 }
 0x245   :  { %v1436_v42 = vpack.c.bf16 %v1950_v41, %v1949_v39  ;;  %v1389_v43 = vpop.f32.mrb[19].mxu1 }
 0x246   :  { %v1435_v44 = vpack.c.bf16 %v1389_v43, %v1386_v40 }
 0x24a   :  { %v1953_v45 = vpop.f32.mrb[20].mxu1 }
 0x24b   :  { %v1402_v46 = vpop.f32.mrb[21].mxu1 }
 0x24c   :  { %v1954_v47 = vpop.f32.mrb[22].mxu1 }
 0x24d   :  { %v1438_v48 = vpack.c.bf16 %v1954_v47, %v1953_v45  ;;  %v1405_v49 = vpop.f32.mrb[23].mxu1 }
 0x24e   :  { %v1437_v50 = vpack.c.bf16 %v1405_v49, %v1402_v46 }
 0x252   :  { %v1957_v51 = vpop.f32.mrb[24].mxu1 }
 0x253   :  { %v1418_v52 = vpop.f32.mrb[25].mxu1 }
 0x254   :  { %v1958_v53 = vpop.f32.mrb[26].mxu1 }
 0x255   :  { %v1440_v54 = vpack.c.bf16 %v1958_v53, %v1957_v51  ;;  %v1421_v55 = vpop.f32.mrb[27].mxu1 }
 0x256   :  { %v1439_v56 = vpack.c.bf16 %v1421_v55, %v1418_v52 }
 0x2b7   :  { %v1475_v57 = vpop.f32.mrb[28].mxu1 }
 0x2b8   :  { %1482 = vmax.xlane.f32.xlu0 %v1475_v57  ;;  %v1977_v58 = vpop.f32.mrb[29].mxu1 }
 0x2b9   :  { %v1478_v59 = vpop.f32.mrb[30].mxu1 }
 0x2ba   :  { %v1978_v60 = vpop.f32.mrb[31].mxu1 }
 0x2bc   :  { %1484 = vmax.xlane.f32.xlu0 %v1478_v59 }
 0x345   :  { %v1483_v2 = vpop.xlane.xlu0 %1482 }
 0x346   :  { %v1486_v3 = vsub.f32 %v1475_v57, %v1483_v2 }
 0x348   :  { %v1488_v4 = vmul.f32 1.442695, %v1486_v3 }
 0x349   :  { %v1485_v5 = vpop.xlane.xlu0 %1484 }
 0x34a   :  { %v1487_v6 = vsub.f32 %v1478_v59, %v1485_v5  ;;  %2239 = vpow2.f32 %v1488_v4 }
 0x34c   :  { %v1490_v7 = vmul.f32 1.442695, %v1487_v6 }
 0x34e   :  { %2241 = vpow2.f32 %v1490_v7 }
 0x354   :  { %v2240_v8 = vpop.eup %2239 }
 0x358   :  { %v2242_v9 = vpop.eup %2241 }
 0x359   :  { %v1492_v10 = vpack.c.bf16 %v2242_v9, %v2240_v8 }
 0x35b   :  { %1996 = vmatmul.mubr.bf16.vlgmr.msra.gmra.mrb[4].mxu0 %v1492_v10 }
 0x35c   :  { %2000 = vmatpush3.bf16.msra.mxu0 %v1433_v37  ;;  %2015 = vmatprep.mubr.msk.bf16.mxu0 %vm2326_vm0, %v2325_v16 }
 0x35d   :  { %2001 = vmatprep.subr.bf16.mxu0 %v2325_v16 }
 0x360   :  { %2002 = vmatpush3.bf16.msra.mxu0 %v1434_v34 }
 0x361   :  { %2003 = vmatprep.subr.bf16.mxu0 %v2325_v16 }
 0x364   :  { %2004 = vmatpush3.bf16.msra.mxu0 %v1435_v44 }
 0x365   :  { %2005 = vmatprep.subr.bf16.mxu0 %v2325_v16 }
 0x368   :  { %2006 = vmatpush3.bf16.msra.mxu0 %v1436_v42 }
 0x369   :  { %2007 = vmatprep.subr.bf16.mxu0 %v2325_v16 }
 0x36c   :  { %2008 = vmatpush3.bf16.msra.mxu0 %v1437_v50 }
 0x36d   :  { %2009 = vmatprep.subr.bf16.mxu0 %v2325_v16 }
 0x370   :  { %2010 = vmatpush3.bf16.msra.mxu0 %v1438_v48 }
 0x371   :  { %2011 = vmatprep.subr.bf16.mxu0 %v2325_v16 }
 0x374   :  { %2012 = vmatpush3.bf16.msra.mxu0 %v1439_v56 }
 0x375   :  { %2013 = vmatprep.subr.bf16.mxu0 %v2325_v16  ;;  %v1810_v16 = vld [vmem:[%s2507_s4 + $0x1] ss:$0 sm:$0xff] }
 0x378   :  { %2014 = vmatpush3.bf16.msra.mxu0 %v1440_v54 }
 0x42e   :  { %v1575_v11 = vpop.f32.mrb[4].mxu0 }
 0x42f   :  { %v1582_v12 = vmax.f32 %v1575_v11, 1e-30  ;;  %v1997_v13 = vpop.f32.mrb[5].mxu0 }
 0x430   :  { %v1578_v14 = vpop.f32.mrb[6].mxu0 }
 0x431   :  { %2243 = vrcp.f32 %v1582_v12  ;;  %v1583_v15 = vmax.f32 %v1578_v14, 1e-30  ;;  %v1998_v17 = vpop.f32.mrb[7].mxu0 }
 0x433   :  { %2245 = vrcp.f32 %v1583_v15 }
 0x43b   :  { %v2244_v18 = vpop.eup %2243 }
 0x43c   :  { %v1586_v20 = vmul.f32 %v2244_v18, %v2240_v8 }
 0x43d   :  { %v2246_v19 = vpop.eup %2245 }
 0x43e   :  { %v1587_v21 = vmul.f32 %v2246_v19, %v2242_v9 }
 0x440   :  { %v1588_v22 = vpack.c.bf16 %v1587_v21, %v1586_v20 }
 0x442   :  { %2016 = vmatmul.mubr.bf16.vlgmr.msra.gmra.mrb[8].mxu0 %v1588_v22 }
 0x515   :  { %v1627_v24 = vpop.f32.mrb[8].mxu0 }
 0x516   :  { %v1628_v25 = vadd.f32 %v1810_v16, %v1627_v24  ;;  %v2017_v26 = vpop.f32.mrb[9].mxu0 }
 0x517   :  { %v1630_v27 = vpop.f32.mrb[10].mxu0 }
 0x518   :  { %1634 = vst [vmem:[#allocation7] sm:$0xff] %v1628_v25  ;;  %v1631_v28 = vadd.f32 %v1810_v16, %v1630_v27  ;;  %v2018_v29 = vpop.f32.mrb[11].mxu0 }
 0x51a   :  { %1635 = vst [vmem:[#allocation7 + $0x8] sm:$0xff] %v1631_v28 }
 0x51b   :  { %2302 = shalt.err (!%p2299_p6)
}
 0x51c   :  { %s2303_s19 = scalar_lea.hbm %s2508_s5, 384 }
 0x51d   :  { %p2304_p7 = scmp.ne.s32.totalorder %s2508_s5, %s2303_s19  ;;  %p2307_p8 = scmp.lt.u32.totalorder %s2303_s19, %s2508_s5 }
 0x51f   :  { %p2309_p9 = pnand %p2307_p8, %p2304_p7 }
 0x521   :  { %2312 = shalt.err (!%p2309_p9)
}
 0x522   :  { %s2329_s23 = smov 128   ;;  %s2330_s24 = smov 8  }
 0x523   :  { %1651 = dma.vmem_to_hbm [thread:$0]  %s1646_s2, 384, %s2508_s5, [#allocation4], %s2329_s23, %s2329_s23, %s2330_s24  }
 0x524   :  { %2317 = dma.done.wait [#allocation4], 384  }
 0x525   :  { %2318 = vsyncadd [#allocation4], 4294966912 }
 0x526   :  { %1655 = vsyncpa [#allocation3], 1 }
 0x527   :  { %1656 = vsyncpa [#allocation6], 1 }
 0x528   :  { %1657 = vsyncpa [#allocation4], 1 }

</bundles_post_ra>
